<compile_context>
chip_gen: v7x
topology: tpu7x:2x2x1
jax: 0.10.0
libtpu: 0.0.40
codegen_flags: <defaults>
</compile_context>

<pallas_src>
import math
import numpy as np
import jax
import jax.numpy as jnp
from jax import lax
from jax.experimental import pallas as pl
from jax.experimental.pallas import tpu as pltpu


def token_embedding_kernel(x3_ref, w_ref, o_ref):
    """One (batch, L-tile) grid point.

    x3_ref: (1, tL, 3C)  circular im2col tile: row l = [x[l-1], x[l], x[l+1]]  (f32)
    w_ref : (3C, D)      stacked conv taps (f32, constant index_map -> VMEM-resident)
    o_ref : (1, tL, D)   output tile (full d_model width; bf16 by default)
    """
    acc = jnp.dot(x3_ref[0], w_ref[...], preferred_element_type=jnp.float32)
    o_ref[0] = acc.astype(o_ref.dtype)


def prepare_token_embedding_weight(weight):
    """(d_model, c_in, 3) PyTorch Conv1d layout -> stacked (3*c_in, d_model) f32.

    Row block k (rows [k*C:(k+1)*C]) multiplies x[(l - 1 + k) mod L].
    Do this once and cache/reuse it rather than rebuilding per forward call.
    """
    d_model, c_in, k = weight.shape
    assert k == 3, "TokenEmbedding uses kernel_size=3"
    w_taps = jnp.transpose(weight, (2, 1, 0))          # (3, C, D)
    return w_taps.reshape(3 * c_in, d_model).astype(jnp.float32)


def _rows_cap_for_vmem(c3, d, out_itemsize, budget_bytes):
    """Max tile rows so double-buffered input + output tiles fit `budget_bytes`."""
    lanes_in = ((c3 + 127) // 128) * 128               # x3 tile lane-padded width
    lanes_out = ((d + 127) // 128) * 128                # out tile lane-padded width
    per_row = 2 * (lanes_in * 4 + lanes_out * out_itemsize)   # double-buffered
    rows = max(8, budget_bytes // per_row)
    return (rows // 8) * 8


def _pick_seq_tile(L, tile_l, rows_cap):
    """Multiple-of-8 tile <= min(tile_l, rows_cap); prefer exact divisors of L."""
    cap = max(8, (min(tile_l, rows_cap) // 8) * 8)
    if L <= cap:
        return L
    for cand in range(cap, 7, -8):
        if L % cand == 0:
            return cand
    return cap      # ragged tail: Pallas masks the partial last block


def token_embedding(x, weight, *, tile_l=1024, out_dtype=jnp.bfloat16):
    """x: (B, L, c_in) float; weight: (d_model, c_in, 3) Conv1d layout or a
    pre-stacked (3*c_in, d_model) array from prepare_token_embedding_weight()."""
    B, L, C = x.shape
    w_stacked = prepare_token_embedding_weight(weight) if weight.ndim == 3 else weight
    assert w_stacked.shape[0] == 3 * C
    D = w_stacked.shape[1]

    # Circular im2col along the sequence axis (one cheap XLA pass; with c_in << d_model
    # the input side stays a small fraction of the kernel's output HBM traffic).
    x3 = jnp.concatenate([jnp.roll(x, 1, axis=1), x, jnp.roll(x, -1, axis=1)], axis=-1)
    if x3.dtype != jnp.float32:
        x3 = x3.astype(jnp.float32)

    out_itemsize = jnp.dtype(out_dtype).itemsize
    vmem_budget = 24 * 1024 * 1024        # conservative for v7x (32 MiB scoped VMEM)
    rows_cap = _rows_cap_for_vmem(3 * C, D, out_itemsize, vmem_budget)
    tL = _pick_seq_tile(L, tile_l, rows_cap)
    nL = pl.cdiv(L, tL)
    if B * nL < 2 and L >= 16:            # keep both v7x TensorCores busy when B == 1
        tL = max(8, (((L + 1) // 2 + 7) // 8) * 8)
        nL = pl.cdiv(L, tL)

    return pl.pallas_call(
        token_embedding_kernel,
        out_shape=jax.ShapeDtypeStruct((B, L, D), out_dtype),
        grid=(B, nL),
        in_specs=[
            pl.BlockSpec((1, tL, 3 * C), lambda b, j: (b, j, 0)),
            pl.BlockSpec((3 * C, D), lambda b, j: (0, 0)),   # VMEM-resident weight
        ],
        out_specs=pl.BlockSpec((1, tL, D), lambda b, j: (b, j, 0)),
        compiler_params=pltpu.CompilerParams(
            dimension_semantics=("parallel", "parallel"),
            vmem_limit_bytes=32 * 1024 * 1024),
    )(x3, w_stacked)


def init_weight(key, c_in, d_model):
    """kaiming_normal_(mode='fan_in', nonlinearity='leaky_relu') like the module."""
    fan_in = c_in * 3
    gain = math.sqrt(2.0 / (1.0 + 0.01 ** 2))       # leaky_relu default slope 0.01
    std = gain / math.sqrt(fan_in)
    return std * jax.random.normal(key, (d_model, c_in, 3), dtype=jnp.float32)


def _reference(x, weight):
    """Circular-conv (padding=1, no bias) reference in numpy float64."""
    xr = np.asarray(x, dtype=np.float64)
    wr = np.asarray(weight, dtype=np.float64)
    w_taps = np.transpose(wr, (2, 1, 0))             # (3, C, D)
    return (np.einsum("blc,cd->bld", np.roll(xr, 1, axis=1), w_taps[0])
            + np.einsum("blc,cd->bld", xr, w_taps[1])
            + np.einsum("blc,cd->bld", np.roll(xr, -1, axis=1), w_taps[2]))


if __name__ == "__main__":
    key = jax.random.PRNGKey(0)
    kx, kw, kx2 = jax.random.split(key, 3)

    # Case 1: toy module shapes, default bf16 output (single L tile, D=32 < 128 so the
    # store path is masked vst -- no padding, no post-kernel slice).
    B, L, c_in, d_model = 2, 8, 4, 32
    x = jax.random.normal(kx, (B, L, c_in), dtype=jnp.float32)
    weight = init_weight(kw, c_in, d_model)
    w_prepared = prepare_token_embedding_weight(weight)      # one-time weight prep

    out = jax.block_until_ready(token_embedding(x, w_prepared))
    assert out.shape == (B, L, d_model)
    assert out.dtype == jnp.bfloat16
    ref = _reference(x, weight)
    np.testing.assert_allclose(np.asarray(out.astype(jnp.float32), dtype=np.float64),
                               ref, rtol=2e-2, atol=2e-2)

    # Case 2: exercise the tiled-sequence path (nL=2) with f32 output.
    L2 = 32
    x2 = jax.random.normal(kx2, (B, L2, c_in), dtype=jnp.float32)
    out2 = jax.block_until_ready(
        token_embedding(x2, weight, tile_l=16, out_dtype=jnp.float32))
    assert out2.shape == (B, L2, d_model)
    assert out2.dtype == jnp.float32
    ref2 = _reference(x2, weight)
    np.testing.assert_allclose(np.asarray(out2, dtype=np.float64),
                               ref2, rtol=2e-2, atol=2e-2)

    print("KERNEL_OK")
</pallas_src>

<mosaic_0001>
module attributes {stable_mosaic.version = 11 : i64} {
  func.func @token_embedding_kernel(%arg0: i32, %arg1: i32, %arg2: memref<1x8x12xf32, #tpu.memory_space<vmem>>, %arg3: memref<12x32xf32, #tpu.memory_space<vmem>>, %arg4: memref<1x8x32xbf16, #tpu.memory_space<vmem>>) attributes {dimension_semantics = [#tpu.dimension_semantics<parallel>, #tpu.dimension_semantics<parallel>], iteration_bounds = array<i64: 2, 1>, scalar_prefetch = 0 : i64, scratch_operands = 0 : i64, tpu.core_type = #tpu.core_type<tc>, window_params = [{transform_indices = @transform_0, window_bounds = array<i64: 1, 8, 12>}, {pipeline_mode = #tpu.pipeline_mode<synchronous>, transform_indices = @transform_1, window_bounds = array<i64: 12, 32>}, {transform_indices = @transform_2, window_bounds = array<i64: 1, 8, 32>}]} {
    %c0 = arith.constant 0 : index
    %c0_0 = arith.constant 0 : index
    %c0_1 = arith.constant 0 : index
    %0 = vector.load %arg2[%c0, %c0_0, %c0_1] : memref<1x8x12xf32, #tpu.memory_space<vmem>>, vector<1x8x12xf32>
    %1 = vector.shape_cast %0 : vector<1x8x12xf32> to vector<8x12xf32>
    %c0_2 = arith.constant 0 : index
    %c0_3 = arith.constant 0 : index
    %2 = vector.load %arg3[%c0_2, %c0_3] : memref<12x32xf32, #tpu.memory_space<vmem>>, vector<12x32xf32>
    %cst = arith.constant dense<0.000000e+00> : vector<8x32xf32>
    %3 = tpu.matmul %1, %2, %cst {dimension_numbers = #tpu.dot_dimension_numbers<[1], [0], [0], [1], [0, 0, 1, 1], [], []>} : vector<8x12xf32>, vector<12x32xf32>, vector<8x32xf32> -> vector<8x32xf32>
    %4 = arith.truncf %3 : vector<8x32xf32> to vector<8x32xbf16>
    %c0_4 = arith.constant 0 : index
    %c0_5 = arith.constant 0 : index
    %c0_6 = arith.constant 0 : index
    %5 = vector.load %arg4[%c0_4, %c0_5, %c0_6] : memref<1x8x32xbf16, #tpu.memory_space<vmem>>, vector<1x8x32xbf16>
    %6 = vector.shape_cast %5 : vector<1x8x32xbf16> to vector<8x32xbf16>
    %7 = vector.shape_cast %4 : vector<8x32xbf16> to vector<1x8x32xbf16>
    tpu.vector_store %arg4[%c0_4, %c0_5, %c0_6], %7 {strides = array<i32>} : memref<1x8x32xbf16, #tpu.memory_space<vmem>>, vector<1x8x32xbf16>,
    return
  }
  func.func @transform_0(%arg0: i32, %arg1: i32) -> (i32, i32, i32) {
    %c0_i32 = arith.constant 0 : i32
    %c0_i32_0 = arith.constant 0 : i32
    return %arg0, %arg1, %c0_i32 : i32, i32, i32
  }
  func.func @transform_1(%arg0: i32, %arg1: i32) -> (i32, i32) {
    %c0_i32 = arith.constant 0 : i32
    %c0_i32_0 = arith.constant 0 : i32
    %c0_i32_1 = arith.constant 0 : i32
    return %c0_i32, %c0_i32_0 : i32, i32
  }
  func.func @transform_2(%arg0: i32, %arg1: i32) -> (i32, i32, i32) {
    %c0_i32 = arith.constant 0 : i32
    %c0_i32_0 = arith.constant 0 : i32
    return %arg0, %arg1, %c0_i32 : i32, i32, i32
  }
}

</mosaic_0001>

<bundles_post_ra>
// kernel: tpu_custom_call.1
= control target key start
LH: loop header
LB: loop body
LE: loop exit
PB: predicated region body
PF: predicated region fallthrough
CT: control target
= control target key end

     0   :  { %7 = vsyncpa [#allocation3], 0  ;;  %s875_s0 = inlined_call_operand.hbm [shape: f32[2,8,12], index: 0, kind: input, shape index: {}]   ;;  %s876_s1 = inlined_call_operand.hbm [shape: f32[12,32], index: 1, kind: input, shape index: {}]   ;;  %s877_s2 = inlined_call_operand.hbm [shape: bf16[2,8,32], index: 2, kind: output, shape index: {}]  }
   0x1   :  { %9 = vsyncpa [#allocation3 + $0x1], 0 }
   0x2   :  { %10 = vsyncpa [#allocation6], 0 }
   0x3   :  { %11 = vsyncpa [#allocation4], 0 }
   0x4   :  { %13 = vsyncpa [#allocation4 + $0x1], 0  ;;  %s660_s9 = smov 0   ;;  %s662_s10 = smov 0  }
   0x5   :  { %s664_s11 = smov 0   ;;  %s666_s12 = smov 0  }
   0x6   :  { %s668_s13 = smov 0   ;;  %s670_s14 = smov 0  }
   0x7 LB: > { %s380_s15 = sadd.s32 4294967295, %s634_s14   ;;  %s381_s16 = sadd.s32 4294967294, %s634_s14   ;;  %s634_s14 = sphi %s670_s14, %s19_s14   ;;  %s630_s13 = sphi %s668_s13, %s901_s13   ;;  %s626_s12 = sphi %s666_s12, %s900_s12   ;;  %s622_s11 = sphi %s664_s11, %s899_s11   ;;  %s618_s10 = sphi %s662_s10, %s898_s10   ;;  %s614_s9 = sphi %s660_s9, %s897_s9  }
   0x8   : > { %p53_p0 = scmp.ne.s32.totalorder %s618_s10, %s614_s9  ;;  %p694_p1 = scmp.eq.s32.totalorder %s380_s15, 0 }
   0x9   : > { %p698_p2 = scmp.eq.s32.totalorder %s380_s15, 1  ;;  %p106_p3 = scmp.eq.s32.totalorder %s381_s16, 1 }
   0xa   : > { %s882_s17 = scalar_select %p694_p1, 1, 0 }
   0xb   : > { %s883_s18 = scalar_select %p698_p2, 1, 0 }
   0xc   : > { %p704_p4 = por %p694_p1, %p53_p0  ;;  %p382_p5 = scmp.ge.s32.totalorder %s634_s14, 1 }
   0xd   : > { %p709_p6 = por %p106_p3, %p53_p0  ;;  %p113_p7 = scmp.lt.s32.totalorder %s634_s14, 3 }
   0xe   : > { %s884_s19 = scalar_select %p704_p4, 1, 0 }
   0xf   : > { %s885_s20 = scalar_select %p709_p6, 1, 0 }
  0x10   : > { %p714_p8 = pnand %p382_p5, %p113_p7  ;;  %s636_s22 = smov [#allocation5]  }
  0x11   : > { %s125_s23 = sshll.u32 %s636_s22, 4  ;;  %s31_s25 = sadd.s32 1, %s630_s13  ;;  %s126_s23 = int_to_ptr.vmem [resolvable:$true] %s125_s23 }
  0x12   : > { %s886_s21 = scalar_select %p714_p8, 1, 0 }
  0x13   : > { %p419_p9 = pneg %p714_p8  ;;  %s490_s28 = scalar_lea.hbm %s876_s1, 256 }
  0x14   : > { %p491_p12 = scmp.ne.s32.totalorder %s876_s1, %s490_s28  ;;  %p497_p5 = scmp.lt.u32.totalorder %s490_s28, %s876_s1 }
  0x15   : > { %p723_p11 = pnand %p419_p9, %p694_p1 }
  0x17   : > { %p492_p13 = pneg %p723_p11 }
  0x19   : > { %p493_p0 = pnand %p492_p13, %p491_p12 }
  0x1b   : > { %p494_p3 = pneg %p493_p0 }
  0x1d   : > { %p499_p7 = pnand %p497_p5, %p494_p3 }
  0x1f   : > { %502 = shalt.err (!%p499_p7)
}
  0x20   : > { %s503_s5 = scalar_lea.vmem %s126_s23, 256  ;;  %p511_p1 = scmp.lt.s32.totalorder %s126_s23, %s126_s23 }
  0x21   : > { %p504_p9 = scmp.ne.s32.totalorder %s126_s23, %s503_s5  ;;  %p512_p4 = scmp.lt.s32.totalorder %s503_s5, %s503_s5 }
  0x23   : > { %p506_p10 = pnand %p504_p9, %p492_p13  ;;  %p513_p8 = por %p512_p4, %p511_p1 }
  0x25   : > { %p507_p6 = pneg %p506_p10 }
  0x27   : > { %p514_p2 = pnand %p513_p8, %p507_p6 }
  0x29   : > { %517 = shalt.err (!%p514_p2)
}
  0x2a   : > { %s637_s6 = smov 128   ;;  %s638_s7 = smov 8  }
  0x2b   : > { %422 = dma.hbm_to_vmem [thread:$0]  (!%p723_p11), %s876_s1, 256, %s126_s23, [#allocation6], %s637_s6, %s637_s6, %s638_s7  }
  0x2c   : > { %p33_p1 = scmp.ge.s32.totalorder %s31_s25, 2  ;;  %s40_s16 = sadd.s32 1, %s622_s11 }
  0x2d   : > { %p47_p2 = scmp.ne.s32.totalorder %s622_s11, %s618_s10  ;;  %p48_p4 = scmp.eq.s32.totalorder %s634_s14, 0 }
  0x2e   : > { %s903_s25 = smov (%p33_p1, %s31_s25), 0  ;;  %p889_p8 = scmp.ne.s32.totalorder %s883_s18, 0 }
  0x2f   : > { %p750_p6 = por %p48_p4, %p47_p2  ;;  %s35_s24 = ssub.s32 %s630_s13, %s903_s25 }
  0x30   : > { %p756_p10 = por %p889_p8, %p47_p2  ;;  %p432_p12 = scmp.lt.s32.totalorder %s634_s14, 2 }
  0x31   : > { %p38_p11 = scmp.eq.s32.totalorder %s35_s24, 0  ;;  %s139_s23 = sand.u32 1, %s622_s11  }
  0x32   : > { %s385_s27 = sshll.u32 %s139_s23, 3  ;;  %s386_s29 = sshll.u32 %s630_s13, 7 }
  0x33   : > { %s765_s28 = scalar_select %p38_p11, %s622_s11, %s40_s16  }
  0x34   : > { %s771_s4 = scalar_lea.hbm %s875_s0, %s386_s29  ;;  %s143_s18 = scalar_lea.vmem [#allocation2], %s385_s27 }
  0x35   : > { %s151_s5 = sshll.u32 %s143_s18, 4  ;;  %p777_p13 = pnand %p432_p12, %p750_p6  ;;  %s773_s5 = int_to_ptr.vmem [resolvable:$true] %s151_s5 }
  0x36   : > { %s140_s7 = scalar_lea.sflag [#allocation3], %s139_s23  ;;  %s518_s8 = scalar_lea.hbm %s771_s4, 128 }
  0x37   : > { %p519_p0 = scmp.ne.s32.totalorder %s771_s4, %s518_s8  ;;  %p520_p3 = pneg %p777_p13 }
  0x38   : > { %s523_s24 = scalar_lea.hbm %s875_s0, 256  ;;  %p524_p9 = scmp.lt.u32.totalorder %s771_s4, %s875_s0 }
  0x39   : > { %p521_p5 = pnand %p520_p3, %p519_p0  ;;  %p525_p1 = scmp.lt.u32.totalorder %s523_s24, %s518_s8 }
  0x3a   : > { %p527_p4 = scmp.lt.u32.totalorder %s518_s8, %s771_s4 }
  0x3b   : > { %p522_p7 = pneg %p521_p5  ;;  %p526_p2 = por %p525_p1, %p524_p9 }
  0x3d   : > { %p528_p6 = por %p527_p4, %p526_p2 }
  0x3f   : > { %p529_p8 = pnand %p528_p6, %p522_p7 }
  0x41   : > { %532 = shalt.err (!%p529_p8)
}
  0x42   : > { %s533_s23 = scalar_lea.vmem %s773_s5, 128  ;;  %s639_s29 = smov [#allocation2]  }
  0x43   : > { %p534_p12 = scmp.ne.s32.totalorder %s773_s5, %s533_s23  ;;  %s538_s30 = sshll.u32 %s639_s29, 4  ;;  %s539_s30 = int_to_ptr.vmem [resolvable:$false] %s538_s30 }
  0x44   : > { %s540_s3 = scalar_lea.vmem %s539_s30, 256  ;;  %p541_p5 = scmp.lt.s32.totalorder %s773_s5, %s539_s30 }
  0x45   : > { %p536_p11 = pnand %p534_p12, %p520_p3  ;;  %p542_p9 = scmp.lt.s32.totalorder %s540_s3, %s533_s23 }
  0x47   : > { %p537_p0 = pneg %p536_p11  ;;  %p543_p1 = por %p542_p9, %p541_p5 }
  0x49   : > { %p544_p2 = pnand %p543_p1, %p537_p0 }
  0x4b   : > { %547 = shalt.err (!%p544_p2)
}
  0x4c   : > { %426 = dma.hbm_to_vmem [thread:$0]  (!%p777_p13), %s771_s4, 128, %s773_s5, %s140_s7  }
  0x4d   : > { %p892_p7 = scmp.ne.s32.totalorder %s886_s21, 0 }
  0x4e   : > { %s809_s18 = sand.u32 (!%p892_p7), 1, %s618_s10   ;;  %p893_p3 = scmp.ne.s32.totalorder (!%p892_p7), %s884_s19, 0 }
  0x4f   : > { %160 = sbr.rel (%p892_p7) target bundleno = 325 (0x145), region = 28  ;;  %s388_s8 = sshll.u32 (!%p892_p7), %s809_s18, 3 }
  0x50   : > { %s163_s15 = scalar_lea.sflag (!%p892_p7), [#allocation3], %s809_s18  ;;  %s166_s16 = scalar_lea.vmem (!%p892_p7), [#allocation2], %s388_s8 }
  0x56   : > { %601 = dma.done.wait (%p893_p3), %s163_s15, 128  }
  0x57   : > { %603 = vsyncadd (%p893_p3), %s163_s15, 4294967168  ;;  %p894_p4 = scmp.ne.s32.totalorder %s882_s17, 0 }
  0x59   : > { %605 = dma.done.wait (%p894_p4), [#allocation6], 256  }
  0x5a   : > { %607 = vsyncadd (%p894_p4), [#allocation6], 4294967040  ;;  %v640_v0 = vmov 0.0|0.0   ;;  %vm641_vm0 = vmmov 0   ;;  %v642_v1 = vmov 0.0   ;;  %vm198_vm1 = vcmask 1043456  }
  0x5b   : > { %407 = vmatprep.subr.bf16.mxu0 %v640_v0  ;;  %404 = vmatprep.mubr.msk.f32.mxu0 %vm641_vm0, %v642_v1  ;;  %v192_v2 = vld [vmem:[#allocation5] sm:$0xff]  ;;  %v193_v3 = vld [vmem:[#allocation5 + $0x8] sm:$0xf]  ;;  %vm643_vm2 = vmmov 1   ;;  %v191_v5 = vld [vmem:[%s166_s16] sm:$0xff]  ;;  %vm194_vm4 = vcmask 97280  }
  0x5c   : > { %vm409_vm3 = vmpackc.low %vm198_vm1, %vm643_vm2  ;;  %v408_v4 = vpack.c.bf16 %v193_v3, %v192_v2  ;;  %s390_s17 = sshll.u32 %s809_s18, 2  ;;  %s394_s19 = sshll.u32 %s626_s12, 6  ;;  %vm273_vm5 = vcmask 257024  }
  0x5d   : > { %s190_s21 = scalar_lea.vmem [#allocation7], %s390_s17  ;;  %s826_s7 = scalar_lea.hbm %s877_s2, %s394_s19 }
  0x5e   : > { %410 = vmatpush3.bf16.msk.msra.mxu0 %vm409_vm3, %v408_v4  ;;  %s290_s4 = sshll.u32 %s190_s21, 4  ;;  %s276_s24 = scalar_lea.sflag [#allocation4], %s809_s18  ;;  %s828_s4 = int_to_ptr.vmem [resolvable:$true] %s290_s4 }
  0x5f   : > { %s548_s22 = scalar_lea.vmem %s828_s4, 64  ;;  %s644_s12 = smov [#allocation7]  }
  0x60   : > { %p549_p13 = scmp.ne.s32.totalorder %s828_s4, %s548_s22  ;;  %s552_s27 = sshll.u32 %s644_s12, 4  ;;  %s553_s27 = int_to_ptr.vmem [resolvable:$false] %s552_s27 }
  0x61   : > { %405 = vmatmul.mubr.msk.f32.vlgmr.msra.gmra.mrb[0].mxu0 %vm194_vm4, %v191_v5  ;;  %s554_s23 = scalar_lea.vmem %s553_s27, 128  ;;  %p555_p12 = scmp.lt.s32.totalorder %s828_s4, %s553_s27 }
  0x62   : > { %p550_p6 = pnand %p549_p13, %p756_p10  ;;  %p556_p11 = scmp.lt.s32.totalorder %s554_s23, %s548_s22 }
  0x64   : > { %p551_p8 = pneg %p550_p6  ;;  %p557_p0 = por %p556_p11, %p555_p12 }
  0x66   : > { %p558_p5 = pnand %p557_p0, %p551_p8 }
 0x134   : > { %v268_v6 = vpop.f32.mrb[0].mxu0 }
 0x135   : > { %v272_v7 = vpack.c.bf16 %v268_v6, %v268_v6  ;;  %v406_v8 = vpop.f32.mrb[1].mxu0 }
 0x137   : > { %274 = vst.msk [vmem:[%s190_s21] sm:$0xf] %vm273_vm5, %v272_v7 }
 0x138   : > { %561 = shalt.err (!%p558_p5)
}
 0x139   : > { %s562_s29 = scalar_lea.hbm %s826_s7, 64  ;;  %s566_s18 = scalar_lea.hbm %s877_s2, 128 }
 0x13a   : > { %p563_p9 = scmp.ne.s32.totalorder %s826_s7, %s562_s29  ;;  %p567_p7 = scmp.lt.u32.totalorder %s826_s7, %s877_s2 }
 0x13b   : > { %p568_p3 = scmp.lt.u32.totalorder %s566_s18, %s562_s29  ;;  %p570_p13 = scmp.lt.u32.totalorder %s562_s29, %s826_s7 }
 0x13c   : > { %p564_p1 = pnand %p563_p9, %p756_p10 }
 0x13d   : > { %p569_p4 = por %p568_p3, %p567_p7 }
 0x13e   : > { %p565_p2 = pneg %p564_p1 }
 0x13f   : > { %p571_p6 = por %p570_p13, %p569_p4 }
 0x141   : > { %p572_p8 = pnand %p571_p6, %p565_p2 }
 0x143   : > { %575 = shalt.err (!%p572_p8)
}
 0x144   : > { %417 = dma.vmem_to_hbm [thread:$0]  (%p756_p10), %s828_s4, 64, %s826_s7, %s276_s24  }
 0x145 PF: > { %s302_s16 = sand.u32 1, %s614_s9   ;;  %p895_p12 = scmp.ne.s32.totalorder %s885_s20, 0 }
 0x146   : > { %p896_p11 = scmp.ge.s32.totalorder %s634_s14, 2  ;;  %s303_s17 = scalar_lea.sflag [#allocation4], %s302_s16 }
 0x148   : > { %p428_p0 = pnand %p896_p11, %p895_p12 }
 0x14a   : > { %609 = dma.done.wait (!%p428_p0), %s303_s17, 64  }
 0x14b   : > { %611 = vsyncadd (!%p428_p0), %s303_s17, 4294967232  ;;  %s19_s14 = sadd.s32 1, %s634_s14   ;;  %s897_s9 = smov %s618_s10 }
 0x14c   : > { %p16_p5 = scmp.ge.s32.totalorder %s19_s14, 4   ;;  %s898_s10 = smov %s622_s11 }
 0x14d   : > { %s899_s11 = smov %s765_s28  ;;  %s900_s12 = smov %s630_s13 }
 0x14e   : > { %s901_s13 = smov %s903_s25  ;;  %18 = sbr.rel (!%p16_p5) target bundleno = 7 (0x7), region = 77 }
 0x155   :  { %308 = vsyncpa [#allocation3], 1 }
 0x156   :  { %310 = vsyncpa [#allocation3 + $0x1], 1 }
 0x157   :  { %311 = vsyncpa [#allocation6], 1 }
 0x158   :  { %312 = vsyncpa [#allocation4], 1 }
 0x159   :  { %314 = vsyncpa [#allocation4 + $0x1], 1 }

</bundles_post_ra>
